<compile_context>
chip_gen: v6e
topology: v6e:2x2x1
jax: 0.10.0
libtpu: 0.0.40
codegen_flags: <defaults>
</compile_context>

<pallas_src>
import jax
import jax.numpy as jnp
from jax.experimental import pallas as pl
from jax.experimental.pallas import tpu as pltpu


def linear_kernel(params_ref, x0_ref, x1_ref, o_ref):
    # params_ref: SMEM (3,) f32 = [w0, w1, b]
    # x0_ref/x1_ref: VMEM (TR, 128) f32 — batch laid out on (sublane, lane)
    # o_ref:        VMEM (TR, 128) f32
    w0 = params_ref[0]
    w1 = params_ref[1]
    b = params_ref[2]
    o_ref[...] = w0 * x0_ref[...] + w1 * x1_ref[...] + b


def linear_forward(x, weight, bias, block_rows=512):
    """x: (N, 2); weight: (1, 2); bias: (1,) -> (N, 1). Same semantics as nn.Linear(2, 1)."""
    n, in_f = x.shape
    out_f = weight.shape[0]
    assert in_f == 2 and out_f == 1

    lanes = 128
    n_rows = pl.cdiv(n, lanes)                       # batch rows of 128 lanes each
    tr = min(block_rows, ((n_rows + 7) // 8) * 8)    # row tile, multiple of 8 sublanes
    n_rows_pad = pl.cdiv(n_rows, tr) * tr
    n_pad = n_rows_pad * lanes

    # Layout plumbing in the wrapper: pad batch, split features, make each
    # feature a lane/sublane-dense (rows, 128) slab.
    xp = jnp.pad(x.astype(jnp.float32), ((0, n_pad - n), (0, 0)))    # (n_pad, 2)
    x0 = xp[:, 0].reshape(n_rows_pad, lanes)
    x1 = xp[:, 1].reshape(n_rows_pad, lanes)
    params = jnp.concatenate(
        [weight.reshape(-1), bias.reshape(-1)]
    ).astype(jnp.float32)                                            # (3,) = [w0, w1, b]

    out2d = pl.pallas_call(
        linear_kernel,
        out_shape=jax.ShapeDtypeStruct((n_rows_pad, lanes), jnp.float32),
        grid_spec=pltpu.PrefetchScalarGridSpec(
            num_scalar_prefetch=0,
            grid=(n_rows_pad // tr,),
            in_specs=[
                pl.BlockSpec(memory_space=pltpu.MemorySpace.SMEM),   # params -> SMEM scalars
                pl.BlockSpec((tr, lanes), lambda i: (i, 0)),         # x0 tile
                pl.BlockSpec((tr, lanes), lambda i: (i, 0)),         # x1 tile
            ],
            out_specs=pl.BlockSpec((tr, lanes), lambda i: (i, 0)),
        ),
        compiler_params=pltpu.CompilerParams(
            dimension_semantics=("parallel",),        # megacore sharding on v7x
            vmem_limit_bytes=32 * 1024 * 1024,
        ),
    )(params, x0, x1)

    return out2d.reshape(n_pad)[:n].reshape(n, out_f).astype(x.dtype)


if __name__ == "__main__":
    key = jax.random.PRNGKey(0)
    kx, kw, kb = jax.random.split(key, 3)

    in_features, out_features = 2, 1
    weight = jax.random.uniform(
        kw, (out_features, in_features), dtype=jnp.float32, minval=-0.5, maxval=0.5
    )
    bias = jax.random.uniform(
        kb, (out_features,), dtype=jnp.float32, minval=-0.5, maxval=0.5
    )

    batch = 8
    x = jax.random.normal(kx, (batch, in_features), dtype=jnp.float32)

    y = linear_forward(x, weight, bias)
    jax.block_until_ready(y)

    y_ref = x @ weight.T + bias
    assert y.shape == (batch, out_features)
    assert jnp.allclose(y, y_ref, atol=1e-5, rtol=1e-5), "mismatch vs reference"

    print("KERNEL_OK")
</pallas_src>

<mosaic_0001>
module attributes {stable_mosaic.version = 11 : i64} {
  func.func @linear_kernel(%arg0: i32, %arg1: memref<3xf32, #tpu.memory_space<smem>>, %arg2: memref<8x128xf32, #tpu.memory_space<vmem>>, %arg3: memref<8x128xf32, #tpu.memory_space<vmem>>, %arg4: memref<8x128xf32, #tpu.memory_space<vmem>>) attributes {dimension_semantics = [#tpu.dimension_semantics<parallel>], iteration_bounds = array<i64: 1>, scalar_prefetch = 0 : i64, scratch_operands = 0 : i64, tpu.core_type = #tpu.core_type<tc>, window_params = [{transform_indices = @transform_0, window_bounds = array<i64: 3>}, {transform_indices = @transform_1, window_bounds = array<i64: 8, 128>}, {transform_indices = @transform_2, window_bounds = array<i64: 8, 128>}, {transform_indices = @transform_3, window_bounds = array<i64: 8, 128>}]} {
    %c0 = arith.constant 0 : index
    %0 = memref.load %arg1[%c0] : memref<3xf32, #tpu.memory_space<smem>>
    %c1 = arith.constant 1 : index
    %1 = memref.load %arg1[%c1] : memref<3xf32, #tpu.memory_space<smem>>
    %c2 = arith.constant 2 : index
    %2 = memref.load %arg1[%c2] : memref<3xf32, #tpu.memory_space<smem>>
    %c0_0 = arith.constant 0 : index
    %c0_1 = arith.constant 0 : index
    %3 = vector.load %arg2[%c0_0, %c0_1] : memref<8x128xf32, #tpu.memory_space<vmem>>, vector<8x128xf32>
    %4 = vector.broadcast %0 : f32 to vector<8x128xf32>
    %5 = arith.mulf %4, %3 : vector<8x128xf32>
    %c0_2 = arith.constant 0 : index
    %c0_3 = arith.constant 0 : index
    %6 = vector.load %arg3[%c0_2, %c0_3] : memref<8x128xf32, #tpu.memory_space<vmem>>, vector<8x128xf32>
    %7 = vector.broadcast %1 : f32 to vector<8x128xf32>
    %8 = arith.mulf %7, %6 : vector<8x128xf32>
    %9 = arith.addf %5, %8 : vector<8x128xf32>
    %10 = vector.broadcast %2 : f32 to vector<8x128xf32>
    %11 = arith.addf %9, %10 : vector<8x128xf32>
    %c0_4 = arith.constant 0 : index
    %c0_5 = arith.constant 0 : index
    %12 = vector.load %arg4[%c0_4, %c0_5] : memref<8x128xf32, #tpu.memory_space<vmem>>, vector<8x128xf32>
    tpu.vector_store %arg4[%c0_4, %c0_5], %11 {strides = array<i32>} : memref<8x128xf32, #tpu.memory_space<vmem>>, vector<8x128xf32>,
    return
  }
  func.func @transform_0(%arg0: i32) -> i32 {
    %c0_i32 = arith.constant 0 : i32
    %c0_i32_0 = arith.constant 0 : i32
    return %c0_i32 : i32
  }
  func.func @transform_1(%arg0: i32) -> (i32, i32) {
    %c0_i32 = arith.constant 0 : i32
    %c0_i32_0 = arith.constant 0 : i32
    return %arg0, %c0_i32 : i32, i32
  }
  func.func @transform_2(%arg0: i32) -> (i32, i32) {
    %c0_i32 = arith.constant 0 : i32
    %c0_i32_0 = arith.constant 0 : i32
    return %arg0, %c0_i32 : i32, i32
  }
  func.func @transform_3(%arg0: i32) -> (i32, i32) {
    %c0_i32 = arith.constant 0 : i32
    %c0_i32_0 = arith.constant 0 : i32
    return %arg0, %c0_i32 : i32, i32
  }
}

</mosaic_0001>

<bundles_post_ra>
// kernel: tpu_custom_call.1
= control target key start
LH: loop header
LB: loop body
LE: loop exit
PB: predicated region body
PF: predicated region fallthrough
CT: control target
= control target key end

     0   :  { %8 = vsyncpa [#allocation5], 0  ;;  %s198_s0 = inlined_call_operand.hbm [shape: f32[3], index: 0, kind: input, shape index: {}]   ;;  %s199_s1 = inlined_call_operand.hbm [shape: f32[8,128], index: 1, kind: input, shape index: {}]   ;;  %s200_s2 = inlined_call_operand.hbm [shape: f32[8,128], index: 2, kind: input, shape index: {}]   ;;  %s201_s3 = inlined_call_operand.hbm [shape: f32[8,128], index: 3, kind: output, shape index: {}]  }
   0x1   :  { %9 = vsyncpa [#allocation3], 0 }
   0x2   :  { %10 = vsyncpa [#allocation8], 0 }
   0x3   :  { %11 = vsyncpa [#allocation4], 0  ;;  %s162_s12 = smov [#allocation2]   ;;  %s163_s15 = smov [#allocation6]  }
   0x4   :  { %19 = dma.hbm_to_smem %s198_s0, 16, %s162_s12, [#allocation5]  }
   0x5   :  { %s26_s16 = sshll.u32 %s163_s15, 4  ;;  %s164_s17 = smov [#allocation7]   ;;  %s27_s16 = int_to_ptr.vmem [resolvable:$true] %s26_s16 }
   0x6   :  { %s36_s18 = sshll.u32 %s164_s17, 4  ;;  %s102_s19 = scalar_lea.vmem %s27_s16, 128  ;;  %s37_s18 = int_to_ptr.vmem [resolvable:$true] %s36_s18 }
   0x7   :  { %p103_p0 = scmp.ne.s32.totalorder %s27_s16, %s102_s19  ;;  %p107_p1 = scmp.lt.s32.totalorder %s27_s16, %s27_s16 }
   0x8   :  { %p108_p2 = scmp.lt.s32.totalorder %s102_s19, %s102_s19 }
   0xa   :  { %p109_p3 = por %p108_p2, %p107_p1 }
   0xc   :  { %p110_p4 = pnand %p109_p3, %p103_p0 }
   0xe   :  { %113 = shalt.err (!%p110_p4)
}
   0xf   :  { %29 = dma.hbm_to_vmem [thread:$0]  %s199_s1, 128, %s27_s16, [#allocation3]  }
  0x10   :  { %s122_s22 = scalar_lea.vmem %s37_s18, 128  ;;  %p127_p6 = scmp.lt.s32.totalorder %s37_s18, %s37_s18 }
  0x11   :  { %p123_p5 = scmp.ne.s32.totalorder %s37_s18, %s122_s22  ;;  %p128_p7 = scmp.lt.s32.totalorder %s122_s22, %s122_s22 }
  0x13   :  { %p129_p8 = por %p128_p7, %p127_p6 }
  0x15   :  { %p130_p9 = pnand %p129_p8, %p123_p5 }
  0x17   :  { %133 = shalt.err (!%p130_p9)
}
  0x18   :  { %39 = dma.hbm_to_vmem [thread:$0]  %s200_s2, 128, %s37_s18, [#allocation8]  }
  0x19   :  { %154 = dma.done.wait [#allocation5], 16  }
  0x1a   :  { %155 = vsyncadd [#allocation5], 4294967280 }
  0x1b   :  { %156 = dma.done.wait [#allocation3], 128  }
  0x1c   :  { %157 = vsyncadd [#allocation3], 4294967168 }
  0x1d   :  { %158 = dma.done.wait [#allocation8], 128  }
  0x1e   :  { %159 = vsyncadd [#allocation8], 4294967168 }
  0x1f   :  { %49 = sfence }
  0x20   :  { %s50_s1 = sld [smem:[#allocation2]]  ;;  %v53_v0 = vld [vmem:[#allocation6] sm:$0xff]  ;;  %v56_v1 = vld [vmem:[#allocation7] sm:$0xff]  ;;  %s165_s26 = smov [#allocation9]  }
  0x21   :  { %s80_s24 = sld [smem:[#allocation2 + $0x1]]  ;;  %s69_s27 = sshll.u32 %s165_s26, 4  ;;  %s70_s27 = int_to_ptr.vmem [resolvable:$true] %s69_s27 }
  0x22   :  { %s81_s25 = sld [smem:[#allocation2 + $0x2]]  ;;  %s134_s2 = scalar_lea.vmem %s70_s27, 128 }
  0x23   :  { %p135_p10 = scmp.ne.s32.totalorder %s70_s27, %s134_s2  ;;  %p139_p11 = scmp.lt.s32.totalorder %s70_s27, %s70_s27 }
  0x24   :  { %p140_p12 = scmp.lt.s32.totalorder %s134_s2, %s134_s2 }
  0x26   :  { %v54_v2 = vstv %s50_s1  ;;  %p141_p13 = por %p140_p12, %p139_p11 }
  0x27   :  { %v55_v3 = vmul.f32 %v54_v2, %v53_v0  ;;  %v57_v4 = vstv %s80_s24 }
  0x28   :  { %v58_v5 = vmul.f32 %v57_v4, %v56_v1  ;;  %v60_v6 = vstv %s81_s25  ;;  %p142_p0 = pnand %p141_p13, %p135_p10 }
  0x2a   :  { %v59_v7 = vadd.f32 %v58_v5, %v55_v3 }
  0x2c   :  { %v61_v8 = vadd.f32 %v60_v6, %v59_v7 }
  0x2e   :  { %62 = vst [vmem:[#allocation9] sm:$0xff] %v61_v8 }
  0x2f   :  { %145 = shalt.err (!%p142_p0)
}
  0x30   :  { %72 = dma.vmem_to_hbm [thread:$0]  %s70_s27, 128, %s201_s3, [#allocation4]  }
  0x31   :  { %160 = dma.done.wait [#allocation4], 128  }
  0x32   :  { %161 = vsyncadd [#allocation4], 4294967168 }
  0x33   :  { %76 = vsyncpa [#allocation3], 1 }
  0x34   :  { %77 = vsyncpa [#allocation8], 1 }
  0x35   :  { %78 = vsyncpa [#allocation4], 1 }
  0x36   :  { %79 = vsyncpa [#allocation5], 1 }

</bundles_post_ra>
